<compile_context>
chip_gen: v6e
topology: v6e:2x2x1
jax: 0.10.0
libtpu: 0.0.40
codegen_flags: <defaults>
</compile_context>

<pallas_src>
import functools

import jax
import jax.numpy as jnp
from jax.experimental import pallas as pl
from jax.experimental.pallas import tpu as pltpu

ALPHA = 0.1
BETA_INIT = 1.5

_LANES = 128
# ~2 MiB per tile; double-buffered input + output => ~8 MiB working set,
# safe on v5e (16 MiB scoped default), v6e (32 MiB) and v7x (32 MiB / 64 MiB).
_TARGET_TILE_BYTES = 2 * 1024 * 1024


def _sublanes_for_dtype(dtype):
    # f32 -> 8 sublanes, bf16/f16 -> 16, int8/fp8 -> 32 (sub-32-bit packs sublanes).
    itemsize = jnp.dtype(dtype).itemsize
    return 8 * max(1, 4 // itemsize)


def _compute_dtype_for(x_dtype):
    """bf16-internal compute only where the VPU/EUP are bf16-native (v6e/v7x)."""
    if jnp.dtype(x_dtype) != jnp.dtype(jnp.bfloat16):
        return jnp.float32
    try:
        kind = jax.devices()[0].device_kind.lower()
    except Exception:  # pragma: no cover - defensive
        kind = ""
    if ("v6" in kind) or ("v7" in kind):
        return jnp.bfloat16
    return jnp.float32  # v5e and older: no bf16 VPU/EUP


def _swisht_kernel(beta_ref, x_ref, o_ref, *, alpha, compute_dtype):
    # sigmoid(z) == 0.5 * (1 + tanh(z / 2)) => 2 EUP pushes per element
    # (two tanh) instead of 3 (exp + recip + tanh).
    half_beta = (0.5 * beta_ref[0, 0]).astype(compute_dtype)  # keep mixed-dtype
    x = x_ref[...].astype(compute_dtype)                      # promotion out
    t_b = jnp.tanh(half_beta * x)
    t_x = jnp.tanh(x)
    y = 0.5 * x * (1.0 + t_b) + alpha * t_x
    o_ref[...] = y.astype(o_ref.dtype)


def _swisht_jnp(x, beta, alpha):
    # Plain-XLA path for the (<128-element) ragged tail / tiny inputs.
    b = beta.reshape(()).astype(jnp.float32)
    xf = x.astype(jnp.float32)
    y = 0.5 * xf * (1.0 + jnp.tanh(0.5 * b * xf)) + alpha * jnp.tanh(xf)
    return y.astype(x.dtype)


def swisht(x, beta, alpha=ALPHA, *, block_rows=None, donate_x=False):
    """Apply SwishT elementwise. x: any shape (NCHW expected), beta: shape (1,)."""
    orig_shape = x.shape
    orig_dtype = x.dtype
    n_elems = x.size

    flat = x.reshape(-1)
    n_bulk = (n_elems // _LANES) * _LANES      # lane-aligned bulk
    tail = flat[n_bulk:] if n_bulk != n_elems else None

    if n_bulk == 0:
        # Fewer than 128 elements: not worth a kernel launch.
        return _swisht_jnp(flat, beta, alpha).reshape(orig_shape)

    rows = n_bulk // _LANES
    x2d = flat[:n_bulk].reshape(rows, _LANES)  # zero-copy view of the bulk

    sublanes = _sublanes_for_dtype(orig_dtype)
    if block_rows is None:
        itemsize = jnp.dtype(orig_dtype).itemsize
        block_rows = max(sublanes, _TARGET_TILE_BYTES // (_LANES * itemsize))

    if rows <= sublanes:
        tr = rows                              # block == full array dims (allowed)
    else:
        tr = min(block_rows, rows)
        tr = max(sublanes, (tr // sublanes) * sublanes)
        # Target >= ~8 grid steps (>= ~4 per v7x TensorCore) when rows allow so
        # the BlockSpec double buffer overlaps DMA with compute.
        desired_blocks = min(8, rows // sublanes)
        if desired_blocks > 1 and pl.cdiv(rows, tr) < desired_blocks:
            tr_new = pl.cdiv(pl.cdiv(rows, desired_blocks), sublanes) * sublanes
            tr = min(tr, max(sublanes, tr_new))
    grid = (pl.cdiv(rows, tr),)                # ragged last block masked by Pallas

    beta_smem = beta.reshape(1, 1).astype(jnp.float32)
    compute_dtype = _compute_dtype_for(orig_dtype)
    kernel = functools.partial(_swisht_kernel, alpha=alpha,
                               compute_dtype=compute_dtype)

    out2d = pl.pallas_call(
        kernel,
        out_shape=jax.ShapeDtypeStruct((rows, _LANES), orig_dtype),
        grid_spec=pltpu.PrefetchScalarGridSpec(
            num_scalar_prefetch=0,
            grid=grid,
            in_specs=[
                pl.BlockSpec(memory_space=pltpu.MemorySpace.SMEM),  # beta scalar
                pl.BlockSpec((tr, _LANES), lambda i: (i, 0)),       # x tile
            ],
            out_specs=pl.BlockSpec((tr, _LANES), lambda i: (i, 0)),
        ),
        compiler_params=pltpu.CompilerParams(
            dimension_semantics=("parallel",),
        ),
        input_output_aliases=({1: 0} if donate_x else {}),
    )(beta_smem, x2d)

    out_flat = out2d.reshape(-1)
    if tail is not None:
        # Tiny (<128 elem) tail handled by XLA; avoids full-tensor pad/slice.
        out_flat = jnp.concatenate([out_flat, _swisht_jnp(tail, beta, alpha)])
    return out_flat.reshape(orig_shape)


def swisht_reference(x, beta, alpha=ALPHA):
    b = beta.reshape(()).astype(jnp.float32)
    xf = x.astype(jnp.float32)
    y = xf * jax.nn.sigmoid(b * xf) + alpha * jnp.tanh(xf)
    return y.astype(x.dtype)


if __name__ == "__main__":
    key = jax.random.PRNGKey(0)
    beta = jnp.array([BETA_INIT], dtype=jnp.float32)

    # Main check: NCHW f32, lane-aligned (no-tail fast path).
    x = jax.random.normal(key, (2, 4, 16, 16), dtype=jnp.float32)
    y = jax.block_until_ready(swisht(x, beta))
    y_ref = swisht_reference(x, beta)
    assert y.shape == x.shape and y.dtype == x.dtype
    assert jnp.allclose(y, y_ref, atol=1e-5, rtol=1e-5), "f32 mismatch vs reference"

    # Odd-size check (exercises the ragged-grid bulk + XLA-tail path).
    x_odd = jax.random.normal(jax.random.PRNGKey(1), (3, 5, 7, 11), dtype=jnp.float32)
    y_odd = jax.block_until_ready(swisht(x_odd, beta))
    assert jnp.allclose(y_odd, swisht_reference(x_odd, beta), atol=1e-5, rtol=1e-5), \
        "odd-shape mismatch vs reference"

    # bf16 check (bf16-internal compute on v6e/v7x, f32 internals on v5e).
    x_bf16 = jax.random.normal(jax.random.PRNGKey(2), (2, 4, 16, 16)).astype(jnp.bfloat16)
    y_bf16 = jax.block_until_ready(swisht(x_bf16, beta))
    assert y_bf16.dtype == jnp.bfloat16
    assert jnp.allclose(y_bf16.astype(jnp.float32),
                        swisht_reference(x_bf16, beta).astype(jnp.float32),
                        atol=3e-2, rtol=3e-2), "bf16 mismatch vs reference"

    print("KERNEL_OK")
</pallas_src>

<mosaic_0001>
module attributes {stable_mosaic.version = 11 : i64} {
  func.func @_swisht_kernel(%arg0: i32, %arg1: memref<1x1xf32, #tpu.memory_space<smem>>, %arg2: memref<8x128xf32, #tpu.memory_space<vmem>>, %arg3: memref<8x128xf32, #tpu.memory_space<vmem>>) attributes {dimension_semantics = [#tpu.dimension_semantics<parallel>], iteration_bounds = array<i64: 2>, scalar_prefetch = 0 : i64, scratch_operands = 0 : i64, tpu.core_type = #tpu.core_type<tc>, window_params = [{transform_indices = @transform_0, window_bounds = array<i64: 1, 1>}, {transform_indices = @transform_1, window_bounds = array<i64: 8, 128>}, {transform_indices = @transform_2, window_bounds = array<i64: 8, 128>}]} {
    %c0 = arith.constant 0 : index
    %c0_0 = arith.constant 0 : index
    %0 = memref.load %arg1[%c0, %c0_0] : memref<1x1xf32, #tpu.memory_space<smem>>
    %cst = arith.constant 5.000000e-01 : f32
    %1 = arith.mulf %cst, %0 : f32
    %c0_1 = arith.constant 0 : index
    %c0_2 = arith.constant 0 : index
    %2 = vector.load %arg2[%c0_1, %c0_2] : memref<8x128xf32, #tpu.memory_space<vmem>>, vector<8x128xf32>
    %3 = vector.broadcast %1 : f32 to vector<8x128xf32>
    %4 = arith.mulf %3, %2 : vector<8x128xf32>
    %5 = math.tanh %4 : vector<8x128xf32>
    %6 = math.tanh %2 : vector<8x128xf32>
    %cst_3 = arith.constant 5.000000e-01 : f32
    %7 = vector.broadcast %cst_3 : f32 to vector<8x128xf32>
    %8 = arith.mulf %7, %2 : vector<8x128xf32>
    %cst_4 = arith.constant 1.000000e+00 : f32
    %9 = vector.broadcast %cst_4 : f32 to vector<8x128xf32>
    %10 = arith.addf %9, %5 : vector<8x128xf32>
    %11 = arith.mulf %8, %10 : vector<8x128xf32>
    %cst_5 = arith.constant 1.000000e-01 : f32
    %12 = vector.broadcast %cst_5 : f32 to vector<8x128xf32>
    %13 = arith.mulf %12, %6 : vector<8x128xf32>
    %14 = arith.addf %11, %13 : vector<8x128xf32>
    %c0_6 = arith.constant 0 : index
    %c0_7 = arith.constant 0 : index
    %15 = vector.load %arg3[%c0_6, %c0_7] : memref<8x128xf32, #tpu.memory_space<vmem>>, vector<8x128xf32>
    tpu.vector_store %arg3[%c0_6, %c0_7], %14 {strides = array<i32>} : memref<8x128xf32, #tpu.memory_space<vmem>>, vector<8x128xf32>,
    return
  }
  func.func @transform_0(%arg0: i32) -> (i32, i32) {
    %c0_i32 = arith.constant 0 : i32
    %c0_i32_0 = arith.constant 0 : i32
    %c0_i32_1 = arith.constant 0 : i32
    return %c0_i32, %c0_i32_0 : i32, i32
  }
  func.func @transform_1(%arg0: i32) -> (i32, i32) {
    %c0_i32 = arith.constant 0 : i32
    %c0_i32_0 = arith.constant 0 : i32
    return %arg0, %c0_i32 : i32, i32
  }
  func.func @transform_2(%arg0: i32) -> (i32, i32) {
    %c0_i32 = arith.constant 0 : i32
    %c0_i32_0 = arith.constant 0 : i32
    return %arg0, %c0_i32 : i32, i32
  }
}

</mosaic_0001>

<bundles_post_ra>
// kernel: tpu_custom_call.1
= control target key start
LH: loop header
LB: loop body
LE: loop exit
PB: predicated region body
PF: predicated region fallthrough
CT: control target
= control target key end

     0   :  { %s574_s0 = inlined_call_operand.<no memory space> [shape: f32[1,1], index: 0, kind: input, shape index: {}]   ;;  %s575_s1 = inlined_call_operand.hbm [shape: f32[16,128], index: 1, kind: input, shape index: {}]   ;;  %s576_s2 = inlined_call_operand.hbm [shape: f32[16,128], index: 2, kind: output, shape index: {}]  }
   0x1   :  { %7 = sst [smem:[#allocation2]] %s574_s0 }
   0x2   :  { %8 = vsyncpa [#allocation4], 0 }
   0x3   :  { %10 = vsyncpa [#allocation4 + $0x1], 0 }
   0x4   :  { %11 = vsyncpa [#allocation5], 0 }
   0x5   :  { %13 = vsyncpa [#allocation5 + $0x1], 0  ;;  %s433_s11 = smov 0   ;;  %s435_s12 = smov 0  }
   0x6   :  { %s437_s13 = smov 0   ;;  %s439_s14 = smov 0  }
   0x7 LB: > { %s454_s0 = sadd.s32 4294967295, %s411_s14   ;;  %s257_s15 = sadd.s32 4294967294, %s411_s14   ;;  %s411_s14 = sphi %s439_s14, %s593_s14   ;;  %s407_s13 = sphi %s437_s13, %s592_s13   ;;  %s403_s12 = sphi %s435_s12, %s591_s12   ;;  %s399_s11 = sphi %s433_s11, %s590_s11  }
   0x8   : > { %s458_s16 = sadd.s32 1, %s411_s14   ;;  %s47_s17 = sadd.s32 1, %s407_s13 }
   0x9   : > { %s44_s18 = ssub.s32 %s411_s14, %s458_s16  ;;  %p54_p0 = scmp.ne.s32.totalorder %s407_s13, %s403_s12 }
   0xa   : > { %p45_p1 = scmp.eq.s32.totalorder %s44_s18, 0  ;;  %p55_p2 = scmp.eq.s32.totalorder %s411_s14, 0 }
   0xb   : > { %p60_p3 = scmp.ne.s32.totalorder %s403_s12, %s399_s11  ;;  %p61_p4 = scmp.eq.s32.totalorder %s454_s0, 0 }
   0xc   : > { %s470_s19 = scalar_select %p45_p1, %s407_s13, %s47_s17  }
   0xd   : > { %p472_p5 = por %p55_p2, %p54_p0  ;;  %p476_p6 = por %p61_p4, %p60_p3 }
   0xe   : > { %p84_p7 = scmp.eq.s32.totalorder %s454_s0, 1  ;;  %p90_p8 = scmp.eq.s32.totalorder %s257_s15, 1 }
   0xf   : > { %s580_s21 = scalar_select %p476_p6, 1, 0 }
  0x10   : > { %p281_p10 = scmp.lt.s32.totalorder %s411_s14, 2  ;;  %p483_p11 = por %p84_p7, %p54_p0 }
  0x11   : > { %p487_p12 = por %p90_p8, %p60_p3  ;;  %s113_s24 = sand.u32 1, %s407_s13  }
  0x12   : > { %s581_s22 = scalar_select %p483_p11, 1, 0 }
  0x13   : > { %s582_s23 = scalar_select %p487_p12, 1, 0 }
  0x14   : > { %s261_s25 = sshll.u32 %s411_s14, 7  ;;  %s260_s26 = sshll.u32 %s113_s24, 3 }
  0x15   : > { %s496_s29 = scalar_lea.hbm %s575_s1, %s261_s25  ;;  %s117_s30 = scalar_lea.vmem [#allocation3], %s260_s26 }
  0x16   : > { %s124_s3 = sshll.u32 %s117_s30, 4  ;;  %p500_p13 = pnand %p281_p10, %p472_p5  ;;  %s504_s3 = int_to_ptr.vmem [resolvable:$true] %s124_s3 }
  0x17   : > { %s114_s5 = scalar_lea.sflag [#allocation4], %s113_s24  ;;  %s319_s6 = scalar_lea.hbm %s496_s29, 128 }
  0x18   : > { %p320_p2 = scmp.ne.s32.totalorder %s496_s29, %s319_s6  ;;  %p321_p3 = pneg %p500_p13 }
  0x19   : > { %s324_s9 = scalar_lea.hbm %s575_s1, 256  ;;  %p325_p5 = scmp.lt.s32.totalorder %s496_s29, %s575_s1 }
  0x1a   : > { %p322_p4 = pnand %p321_p3, %p320_p2  ;;  %p326_p8 = scmp.lt.s32.totalorder %s324_s9, %s319_s6 }
  0x1c   : > { %p323_p7 = pneg %p322_p4  ;;  %p327_p10 = por %p326_p8, %p325_p5 }
  0x1e   : > { %p328_p9 = pnand %p327_p10, %p323_p7 }
  0x20   : > { %331 = shalt.err (!%p328_p9)
}
  0x21   : > { %s332_s17 = scalar_lea.vmem %s504_s3, 128  ;;  %s413_s18 = smov [#allocation3]  }
  0x22   : > { %p333_p0 = scmp.ne.s32.totalorder %s504_s3, %s332_s17  ;;  %s337_s20 = sshll.u32 %s413_s18, 4  ;;  %s338_s20 = int_to_ptr.vmem [resolvable:$false] %s337_s20 }
  0x23   : > { %s339_s24 = scalar_lea.vmem %s338_s20, 256  ;;  %p340_p4 = scmp.lt.s32.totalorder %s504_s3, %s338_s20 }
  0x24   : > { %p335_p1 = pnand %p333_p0, %p321_p3  ;;  %p341_p12 = scmp.lt.s32.totalorder %s339_s24, %s332_s17 }
  0x26   : > { %p336_p2 = pneg %p335_p1  ;;  %p342_p11 = por %p341_p12, %p340_p4 }
  0x28   : > { %p343_p6 = pnand %p342_p11, %p336_p2 }
  0x2a   : > { %346 = shalt.err (!%p343_p6)
}
  0x2b   : > { %276 = dma.hbm_to_vmem [thread:$0]  (!%p500_p13), %s496_s29, 128, %s504_s3, %s114_s5  }
  0x2c   : > { %p584_p9 = scmp.lt.s32.totalorder %s411_s14, 3  ;;  %p585_p7 = scmp.ge.s32.totalorder %s411_s14, 1 }
  0x2e   : > { %p130_p0 = pnand %p585_p7, %p584_p9 }
  0x2f   : > { %s531_s25 = sand.u32 (!%p130_p0), 1, %s403_s12   ;;  %p586_p6 = scmp.ne.s32.totalorder (!%p130_p0), %s580_s21, 0 }
  0x30   : > { %133 = sbr.rel (%p130_p0) target bundleno = 98 (0x62), region = 28  ;;  %s263_s26 = sshll.u32 (!%p130_p0), %s531_s25, 3 }
  0x31   : > { %s136_s27 = scalar_lea.sflag (!%p130_p0), [#allocation4], %s531_s25  ;;  %s139_s28 = scalar_lea.vmem (!%p130_p0), [#allocation3], %s263_s26 }
  0x35   : > { %390 = dma.done.wait (%p586_p6), %s136_s27, 128  }
  0x36   : > { %392 = vsyncadd (%p586_p6), %s136_s27, 4294967168  ;;  %s160_s29 = sld [smem:[#allocation2]]  ;;  %v162_v0 = vld [vmem:[%s139_s28] sm:$0xff]  ;;  %s159_s3 = scalar_lea.vmem [#allocation6], %s263_s26 }
  0x37   : > { %315 = vtanh.f32 %v162_v0  ;;  %v167_v4 = vmul.f32 0.5, %v162_v0  ;;  %s187_s4 = sshll.u32 %s159_s3, 4  ;;  %s266_s5 = sshll.u32 %s454_s0, 7  ;;  %s188_s4 = int_to_ptr.vmem [resolvable:$true] %s187_s4 }
  0x38   : > { %s185_s7 = scalar_lea.hbm %s576_s2, %s266_s5  ;;  %s174_s8 = scalar_lea.sflag [#allocation5], %s531_s25 }
  0x39   : > { %s347_s9 = scalar_lea.vmem %s188_s4, 128  ;;  %p587_p12 = scmp.ne.s32.totalorder %s581_s22, 0 }
  0x3a   : > { %p348_p11 = scmp.ne.s32.totalorder %s188_s4, %s347_s9  ;;  %s414_s10 = smov [#allocation6]  }
  0x3b   : > { %s351_s15 = sshll.u32 %s414_s10, 4  ;;  %s352_s15 = int_to_ptr.vmem [resolvable:$false] %s351_s15 }
  0x3c   : > { %s161_s30 = smul.f32 0.5, %s160_s29  ;;  %p349_p13 = pnand %p348_p11, %p587_p12 }
  0x3d   : > { %s353_s17 = scalar_lea.vmem %s352_s15, 256  ;;  %p354_p3 = scmp.lt.s32.totalorder %s188_s4, %s352_s15 }
  0x3e   : > { %v163_v1 = vstv %s161_s30  ;;  %p350_p1 = pneg %p349_p13  ;;  %p355_p5 = scmp.lt.s32.totalorder %s353_s17, %s347_s9 }
  0x3f   : > { %v164_v2 = vmul.f32 %v163_v1, %v162_v0 }
  0x40   : > { %p356_p8 = por %p355_p5, %p354_p3 }
  0x41   : > { %317 = vtanh.f32 %v164_v2 }
  0x42   : > { %p357_p10 = pnand %p356_p8, %p350_p1 }
  0x44   : > { %v316_v3 = vpop.eup %315 }
  0x45   : > { %v170_v7 = vmul.f32 0.1, %v316_v3 }
  0x4e   : > { %v318_v5 = vpop.eup %317 }
  0x4f   : > { %v168_v6 = vadd.f32 1.0, %v318_v5 }
  0x51   : > { %v169_v8 = vmul.f32 %v168_v6, %v167_v4 }
  0x53   : > { %v171_v9 = vadd.f32 %v170_v7, %v169_v8 }
  0x55   : > { %172 = vst [vmem:[%s159_s3] sm:$0xff] %v171_v9 }
  0x56   : > { %360 = shalt.err (!%p357_p10)
}
  0x57   : > { %s361_s0 = scalar_lea.hbm %s185_s7, 128  ;;  %s365_s24 = scalar_lea.hbm %s576_s2, 256 }
  0x58   : > { %p362_p2 = scmp.ne.s32.totalorder %s185_s7, %s361_s0  ;;  %p366_p7 = scmp.lt.s32.totalorder %s185_s7, %s576_s2 }
  0x59   : > { %p367_p0 = scmp.lt.s32.totalorder %s365_s24, %s361_s0 }
  0x5a   : > { %p363_p4 = pnand %p362_p2, %p587_p12 }
  0x5b   : > { %p368_p6 = por %p367_p0, %p366_p7 }
  0x5c   : > { %p364_p9 = pneg %p363_p4 }
  0x5e   : > { %p369_p11 = pnand %p368_p6, %p364_p9 }
  0x60   : > { %372 = shalt.err (!%p369_p11)
}
  0x61   : > { %271 = dma.vmem_to_hbm [thread:$0]  (%p587_p12), %s188_s4, 128, %s185_s7, %s174_s8  }
  0x62 PF: > { %s199_s27 = sand.u32 1, %s399_s11   ;;  %p588_p13 = scmp.ne.s32.totalorder %s582_s23, 0 }
  0x63   : > { %p589_p1 = scmp.ge.s32.totalorder %s411_s14, 2  ;;  %s200_s28 = scalar_lea.sflag [#allocation5], %s199_s27 }
  0x65   : > { %p278_p3 = pnand %p589_p1, %p588_p13 }
  0x67   : > { %p279_p5 = pneg %p278_p3 }
  0x69   : > { %394 = dma.done.wait (%p279_p5), %s200_s28, 128  }
  0x6a   : > { %396 = vsyncadd (%p279_p5), %s200_s28, 4294967168  ;;  %p16_p8 = scmp.ge.s32.totalorder %s458_s16, 4   ;;  %s590_s11 = smov %s403_s12 }
  0x6b   : > { %s591_s12 = smov %s407_s13  ;;  %s592_s13 = smov %s470_s19 }
  0x6c   : > { %s593_s14 = smov %s458_s16  ;;  %18 = sbr.rel (!%p16_p8) target bundleno = 7 (0x7), region = 73 }
  0x71   :  { %205 = vsyncpa [#allocation4], 1 }
  0x72   :  { %207 = vsyncpa [#allocation4 + $0x1], 1 }
  0x73   :  { %208 = vsyncpa [#allocation5], 1 }
  0x74   :  { %210 = vsyncpa [#allocation5 + $0x1], 1 }

</bundles_post_ra>
